<compile_context>
chip_gen: v7x
topology: tpu7x:2x2x1
jax: 0.10.0
libtpu: 0.0.40
codegen_flags: <defaults>
</compile_context>

<pallas_src>
import jax
import jax.numpy as jnp
from jax.experimental import pallas as pl
from jax.experimental.pallas import tpu as pltpu

K_IN = 28 * 28      # 784
K_PAD = 896         # 7 * 128, lane-aligned contraction dim
HIDDEN = 128
OUT = 10
OUT_PAD = 128       # lane-dense output slab


def mlp_kernel(x_ref, w1_ref, b1_ref, w2_ref, b2_ref, o_ref):
    # fc1: bf16 inputs, f32 accumulation on the MXU.
    h = jnp.dot(x_ref[...], w1_ref[...], preferred_element_type=jnp.float32)
    h = jnp.maximum(h + b1_ref[...], 0.0)
    # fc2: output padded to 128 lanes -> unmasked stores, clean 128x128 tile.
    out = jnp.dot(h.astype(w2_ref.dtype), w2_ref[...],
                  preferred_element_type=jnp.float32)
    o_ref[...] = (out + b2_ref[...]).astype(o_ref.dtype)


def _round_up(x, m):
    return (x + m - 1) // m * m


def net_forward(x, w1, b1, w2, b2, *, tile_n=512):
    """Forward pass of Net: fc1 -> ReLU -> fc2.

    x:  (N, 1, 28, 28) float32 (NCHW, like PyTorch)
    w1: (784, 128), b1: (128,), w2: (128, 10), b2: (10,)
    returns: (N, 10) float32
    """
    n = x.shape[0]
    x2d = x.reshape(n, K_IN)                     # == torch .view(-1, 784)

    # bf16 HBM streams (accumulation stays f32 inside the kernel).
    x_bf = x2d.astype(jnp.bfloat16)
    w1_bf = w1.astype(jnp.bfloat16)
    w2_bf = w2.astype(jnp.bfloat16)

    # K padding 784 -> 896 with zeros: aligned (8,128) tiles, full MXU K pass.
    x_p = jnp.pad(x_bf, ((0, 0), (0, K_PAD - K_IN)))
    w1_p = jnp.pad(w1_bf, ((0, K_PAD - K_IN), (0, 0)))

    # Output padding 10 -> 128 with zeros: lane-dense out_spec.
    w2_p = jnp.pad(w2_bf, ((0, 0), (0, OUT_PAD - OUT)))
    b2_p = jnp.pad(b2.astype(jnp.float32), (0, OUT_PAD - OUT)).reshape(1, OUT_PAD)
    b1_r = b1.astype(jnp.float32).reshape(1, HIDDEN)

    # Batch tiling: one small tile at tiny N (launch-bound regime), otherwise
    # 512-row tiles (multiple of 256 for v6e/v7x MXU; ~0.9 MiB bf16 per x tile,
    # double-buffered well within the 16/32 MiB scoped VMEM limits).
    tn = min(tile_n, _round_up(n, 8))
    n_pad = _round_up(n, tn)
    if n_pad != n:
        x_p = jnp.pad(x_p, ((0, n_pad - n), (0, 0)))

    grid = (n_pad // tn,)

    flops = 2 * n_pad * (K_PAD * HIDDEN + HIDDEN * OUT_PAD)
    bytes_accessed = (
        n_pad * K_PAD * 2               # x (bf16)
        + K_PAD * HIDDEN * 2            # w1 (bf16)
        + HIDDEN * OUT_PAD * 2          # w2 (bf16)
        + (HIDDEN + OUT_PAD) * 4        # biases (f32)
        + n_pad * OUT_PAD * 4           # output (f32)
    )

    out_padded = pl.pallas_call(
        mlp_kernel,
        out_shape=jax.ShapeDtypeStruct((n_pad, OUT_PAD), jnp.float32),
        grid_spec=pltpu.PrefetchScalarGridSpec(
            num_scalar_prefetch=0,
            grid=grid,
            in_specs=[
                pl.BlockSpec((tn, K_PAD), lambda i: (i, 0)),         # x tiles
                pl.BlockSpec((K_PAD, HIDDEN), lambda i: (0, 0)),     # w1 (pinned)
                pl.BlockSpec((1, HIDDEN), lambda i: (0, 0)),         # b1 (pinned)
                pl.BlockSpec((HIDDEN, OUT_PAD), lambda i: (0, 0)),   # w2 (pinned)
                pl.BlockSpec((1, OUT_PAD), lambda i: (0, 0)),        # b2 (pinned)
            ],
            out_specs=pl.BlockSpec((tn, OUT_PAD), lambda i: (i, 0)),
        ),
        compiler_params=pltpu.CompilerParams(
            dimension_semantics=("parallel",),   # megacore on v7x
        ),
        cost_estimate=pl.CostEstimate(
            flops=flops, transcendentals=0, bytes_accessed=bytes_accessed),
    )(x_p, w1_p, b1_r, w2_p, b2_p)

    return out_padded[:n, :OUT]


def init_params(key):
    """Deterministic init mimicking nn.Linear's uniform(-1/sqrt(fan_in), +)."""
    k1, k2, k3, k4 = jax.random.split(key, 4)
    bound1 = 1.0 / jnp.sqrt(784.0)
    bound2 = 1.0 / jnp.sqrt(128.0)
    w1 = jax.random.uniform(k1, (784, 128), jnp.float32, -bound1, bound1)
    b1 = jax.random.uniform(k2, (128,), jnp.float32, -bound1, bound1)
    w2 = jax.random.uniform(k3, (128, 10), jnp.float32, -bound2, bound2)
    b2 = jax.random.uniform(k4, (10,), jnp.float32, -bound2, bound2)
    return w1, b1, w2, b2


if __name__ == "__main__":
    key = jax.random.PRNGKey(0)
    kx, kp = jax.random.split(key)

    batch = 8
    x = jax.random.normal(kx, (batch, 1, 28, 28), jnp.float32)
    w1, b1, w2, b2 = init_params(kp)

    out = net_forward(x, w1, b1, w2, b2)
    out = jax.block_until_ready(out)

    # Pure-JAX f32 reference of the same math (kernel uses bf16 streams with
    # f32 accumulation, so tolerance is loosened accordingly).
    x2d = x.reshape(batch, 784)
    ref = jnp.maximum(x2d @ w1 + b1, 0.0) @ w2 + b2
    assert out.shape == (batch, 10)
    assert jnp.allclose(out, ref, atol=5e-2, rtol=5e-2), (
        float(jnp.max(jnp.abs(out - ref))))

    print("KERNEL_OK")
</pallas_src>

<mosaic_0001>
module attributes {stable_mosaic.version = 11 : i64} {
  func.func @mlp_kernel(%arg0: i32, %arg1: memref<8x896xbf16, #tpu.memory_space<vmem>>, %arg2: memref<896x128xbf16, #tpu.memory_space<vmem>>, %arg3: memref<1x128xf32, #tpu.memory_space<vmem>>, %arg4: memref<128x128xbf16, #tpu.memory_space<vmem>>, %arg5: memref<1x128xf32, #tpu.memory_space<vmem>>, %arg6: memref<8x128xf32, #tpu.memory_space<vmem>>) attributes {dimension_semantics = [#tpu.dimension_semantics<parallel>], iteration_bounds = array<i64: 1>, scalar_prefetch = 0 : i64, scratch_operands = 0 : i64, tpu.core_type = #tpu.core_type<tc>, window_params = [{transform_indices = @transform_0, window_bounds = array<i64: 8, 896>}, {pipeline_mode = #tpu.pipeline_mode<synchronous>, transform_indices = @transform_1, window_bounds = array<i64: 896, 128>}, {pipeline_mode = #tpu.pipeline_mode<synchronous>, transform_indices = @transform_2, window_bounds = array<i64: 1, 128>}, {pipeline_mode = #tpu.pipeline_mode<synchronous>, transform_indices = @transform_3, window_bounds = array<i64: 128, 128>}, {pipeline_mode = #tpu.pipeline_mode<synchronous>, transform_indices = @transform_4, window_bounds = array<i64: 1, 128>}, {transform_indices = @transform_5, window_bounds = array<i64: 8, 128>}]} {
    %c0 = arith.constant 0 : index
    %c0_0 = arith.constant 0 : index
    %0 = vector.load %arg1[%c0, %c0_0] : memref<8x896xbf16, #tpu.memory_space<vmem>>, vector<8x896xbf16>
    %c0_1 = arith.constant 0 : index
    %c0_2 = arith.constant 0 : index
    %1 = vector.load %arg2[%c0_1, %c0_2] : memref<896x128xbf16, #tpu.memory_space<vmem>>, vector<896x128xbf16>
    %cst = arith.constant dense<0.000000e+00> : vector<8x128xf32>
    %2 = tpu.matmul %0, %1, %cst {dimension_numbers = #tpu.dot_dimension_numbers<[1], [0], [0], [1], [0, 0, 1, 1], [], []>} : vector<8x896xbf16>, vector<896x128xbf16>, vector<8x128xf32> -> vector<8x128xf32>
    %c0_3 = arith.constant 0 : index
    %c0_4 = arith.constant 0 : index
    %3 = vector.load %arg3[%c0_3, %c0_4] : memref<1x128xf32, #tpu.memory_space<vmem>>, vector<1x128xf32>
    %4 = vector.broadcast %3 : vector<1x128xf32> to vector<8x128xf32>
    %5 = arith.addf %2, %4 : vector<8x128xf32>
    %cst_5 = arith.constant 0.000000e+00 : f32
    %6 = vector.broadcast %cst_5 : f32 to vector<8x128xf32>
    %7 = arith.maximumf %5, %6 : vector<8x128xf32>
    %8 = arith.truncf %7 : vector<8x128xf32> to vector<8x128xbf16>
    %c0_6 = arith.constant 0 : index
    %c0_7 = arith.constant 0 : index
    %9 = vector.load %arg4[%c0_6, %c0_7] : memref<128x128xbf16, #tpu.memory_space<vmem>>, vector<128x128xbf16>
    %cst_8 = arith.constant dense<0.000000e+00> : vector<8x128xf32>
    %10 = tpu.matmul %8, %9, %cst_8 {dimension_numbers = #tpu.dot_dimension_numbers<[1], [0], [0], [1], [0, 0, 1, 1], [], []>} : vector<8x128xbf16>, vector<128x128xbf16>, vector<8x128xf32> -> vector<8x128xf32>
    %c0_9 = arith.constant 0 : index
    %c0_10 = arith.constant 0 : index
    %11 = vector.load %arg5[%c0_9, %c0_10] : memref<1x128xf32, #tpu.memory_space<vmem>>, vector<1x128xf32>
    %12 = vector.broadcast %11 : vector<1x128xf32> to vector<8x128xf32>
    %13 = arith.addf %10, %12 : vector<8x128xf32>
    %c0_11 = arith.constant 0 : index
    %c0_12 = arith.constant 0 : index
    %14 = vector.load %arg6[%c0_11, %c0_12] : memref<8x128xf32, #tpu.memory_space<vmem>>, vector<8x128xf32>
    tpu.vector_store %arg6[%c0_11, %c0_12], %13 {strides = array<i32>} : memref<8x128xf32, #tpu.memory_space<vmem>>, vector<8x128xf32>,
    return
  }
  func.func @transform_0(%arg0: i32) -> (i32, i32) {
    %c0_i32 = arith.constant 0 : i32
    %c0_i32_0 = arith.constant 0 : i32
    return %arg0, %c0_i32 : i32, i32
  }
  func.func @transform_1(%arg0: i32) -> (i32, i32) {
    %c0_i32 = arith.constant 0 : i32
    %c0_i32_0 = arith.constant 0 : i32
    %c0_i32_1 = arith.constant 0 : i32
    return %c0_i32, %c0_i32_0 : i32, i32
  }
  func.func @transform_2(%arg0: i32) -> (i32, i32) {
    %c0_i32 = arith.constant 0 : i32
    %c0_i32_0 = arith.constant 0 : i32
    %c0_i32_1 = arith.constant 0 : i32
    return %c0_i32, %c0_i32_0 : i32, i32
  }
  func.func @transform_3(%arg0: i32) -> (i32, i32) {
    %c0_i32 = arith.constant 0 : i32
    %c0_i32_0 = arith.constant 0 : i32
    %c0_i32_1 = arith.constant 0 : i32
    return %c0_i32, %c0_i32_0 : i32, i32
  }
  func.func @transform_4(%arg0: i32) -> (i32, i32) {
    %c0_i32 = arith.constant 0 : i32
    %c0_i32_0 = arith.constant 0 : i32
    %c0_i32_1 = arith.constant 0 : i32
    return %c0_i32, %c0_i32_0 : i32, i32
  }
  func.func @transform_5(%arg0: i32) -> (i32, i32) {
    %c0_i32 = arith.constant 0 : i32
    %c0_i32_0 = arith.constant 0 : i32
    return %arg0, %c0_i32 : i32, i32
  }
}

</mosaic_0001>

<bundles_post_ra>
// kernel: tpu_custom_call.1
= control target key start
LH: loop header
LB: loop body
LE: loop exit
PB: predicated region body
PF: predicated region fallthrough
CT: control target
= control target key end

     0   :  { %10 = vsyncpa [#allocation3], 0  ;;  %s1323_s0 = inlined_call_operand.hbm [shape: bf16[8,896], index: 0, kind: input, shape index: {}]   ;;  %s1324_s1 = inlined_call_operand.hbm [shape: bf16[896,128], index: 1, kind: input, shape index: {}]   ;;  %s1325_s2 = inlined_call_operand.vmem [shape: f32[1,128], index: 2, kind: input, shape index: {}]   ;;  %s1326_s3 = inlined_call_operand.hbm [shape: bf16[128,128], index: 3, kind: input, shape index: {}]   ;;  %s1327_s4 = inlined_call_operand.vmem [shape: f32[1,128], index: 4, kind: input, shape index: {}]   ;;  %s1328_s5 = inlined_call_operand.hbm [shape: f32[8,128], index: 5, kind: output, shape index: {}]  }
   0x1   :  { %11 = vsyncpa [#allocation6], 0 }
   0x2   :  { %12 = vsyncpa [#allocation4], 0  ;;  %s1205_s18 = smov [#allocation5]   ;;  %s1111_s22 = scalar_lea.hbm %s1324_s1, 7168 }
   0x3   :  { %s28_s19 = sshll.u32 %s1205_s18, 4  ;;  %p1112_p0 = scmp.ne.s32.totalorder %s1324_s1, %s1111_s22  ;;  %s29_s19 = int_to_ptr.vmem [resolvable:$true] %s28_s19 }
   0x4   :  { %p1115_p1 = scmp.lt.u32.totalorder %s1111_s22, %s1324_s1 }
   0x6   :  { %p1117_p2 = pnand %p1115_p1, %p1112_p0 }
   0x8   :  { %1120 = shalt.err (!%p1117_p2)
}
   0x9   :  { %s1121_s27 = scalar_lea.vmem %s29_s19, 7168  ;;  %p1126_p4 = scmp.lt.s32.totalorder %s29_s19, %s29_s19 }
   0xa   :  { %p1122_p3 = scmp.ne.s32.totalorder %s29_s19, %s1121_s27  ;;  %p1127_p5 = scmp.lt.s32.totalorder %s1121_s27, %s1121_s27 }
   0xc   :  { %p1128_p6 = por %p1127_p5, %p1126_p4 }
   0xe   :  { %p1129_p7 = pnand %p1128_p6, %p1122_p3 }
  0x10   :  { %1132 = shalt.err (!%p1129_p7)
}
  0x11   :  { %s1206_s28 = smov 64   ;;  %s1207_s29 = smov 4  }
  0x12   :  { %34 = dma.hbm_to_vmem [thread:$0]  %s1324_s1, 7168, %s29_s19, [#allocation6], %s1206_s28, %s1206_s28, %s1207_s29  }
  0x13   :  { %s1208_s7 = smov [#allocation2]   ;;  %s1209_s9 = smov [#allocation7]  }
  0x14   :  { %s19_s8 = sshll.u32 %s1208_s7, 4  ;;  %s42_s10 = sshll.u32 %s1209_s9, 4  ;;  %s20_s8 = int_to_ptr.vmem [resolvable:$true] %s19_s8  ;;  %s43_s10 = int_to_ptr.vmem [resolvable:$true] %s42_s10 }
  0x15   :  { %s1133_s13 = scalar_lea.hbm %s1323_s0, 448 }
  0x16   :  { %p1134_p8 = scmp.ne.s32.totalorder %s1323_s0, %s1133_s13  ;;  %p1137_p9 = scmp.lt.u32.totalorder %s1133_s13, %s1323_s0 }
  0x18   :  { %p1139_p10 = pnand %p1137_p9, %p1134_p8 }
  0x1a   :  { %1142 = shalt.err (!%p1139_p10)
}
  0x1b   :  { %s1143_s1 = scalar_lea.vmem %s20_s8, 448  ;;  %p1148_p12 = scmp.lt.s32.totalorder %s20_s8, %s20_s8 }
  0x1c   :  { %p1144_p11 = scmp.ne.s32.totalorder %s20_s8, %s1143_s1  ;;  %p1149_p13 = scmp.lt.s32.totalorder %s1143_s1, %s1143_s1 }
  0x1e   :  { %p1150_p0 = por %p1149_p13, %p1148_p12 }
  0x20   :  { %p1151_p1 = pnand %p1150_p0, %p1144_p11 }
  0x22   :  { %1154 = shalt.err (!%p1151_p1)
}
  0x23   :  { %22 = dma.hbm_to_vmem [thread:$0]  %s1323_s0, 448, %s20_s8, [#allocation3]  }
  0x24   :  { %s1155_s22 = scalar_lea.hbm %s1326_s3, 1024 }
  0x25   :  { %p1156_p2 = scmp.ne.s32.totalorder %s1326_s3, %s1155_s22  ;;  %p1159_p3 = scmp.lt.u32.totalorder %s1155_s22, %s1326_s3 }
  0x27   :  { %p1161_p4 = pnand %p1159_p3, %p1156_p2 }
  0x29   :  { %1164 = shalt.err (!%p1161_p4)
}
  0x2a   :  { %s1165_s27 = scalar_lea.vmem %s43_s10, 1024  ;;  %p1170_p6 = scmp.lt.s32.totalorder %s43_s10, %s43_s10 }
  0x2b   :  { %p1166_p5 = scmp.ne.s32.totalorder %s43_s10, %s1165_s27  ;;  %p1171_p7 = scmp.lt.s32.totalorder %s1165_s27, %s1165_s27 }
  0x2d   :  { %p1172_p8 = por %p1171_p7, %p1170_p6 }
  0x2f   :  { %p1173_p9 = pnand %p1172_p8, %p1166_p5 }
  0x31   :  { %1176 = shalt.err (!%p1173_p9)
}
  0x32   :  { %48 = dma.hbm_to_vmem [thread:$0]  %s1326_s3, 1024, %s43_s10, [#allocation6], %s1206_s28, %s1206_s28, %s1207_s29  }
  0x33   :  { %1199 = dma.done.wait [#allocation3], 448  }
  0x34   :  { %1200 = vsyncadd [#allocation3], 4294966848 }
  0x35   :  { %1201 = dma.done.wait [#allocation6], 8192  }
  0x36   :  { %1202 = vsyncadd [#allocation6], 4294959104  ;;  %v1040_v0 = vld [vmem:[#allocation5 + $0x40] sm:$0xff]   ;;  %v1044_v4 = vld [vmem:[#allocation5 + $0x48] sm:$0xff]   ;;  %v1210_v42 = vmov 0.0   ;;  %vm1211_vm0 = vmmov 0  }
  0x37   :  { %v1041_v1 = vld [vmem:[#allocation5] sm:$0xff]   ;;  %908 = vmatprep.subr.bf16.mxu0 %v1040_v0  ;;  %v1045_v5 = vld [vmem:[#allocation5 + $0x8] sm:$0xff]   ;;  %v1048_v8 = vld [vmem:[#allocation5 + $0x50] sm:$0xff]   ;;  %s1212_s6 = smov [#allocation8]  }
  0x38   :  { %v1042_v2 = vld [vmem:[#allocation5 + $0xc0] sm:$0xff]   ;;  %909 = vmatpush3.bf16.msra.mxu0 %v1041_v1  ;;  %v1046_v6 = vld [vmem:[#allocation5 + $0xc8] sm:$0xff]   ;;  %v1049_v9 = vld [vmem:[#allocation5 + $0x10] sm:$0xff]   ;;  %s825_s7 = sshll.u32 %s1212_s6, 4  ;;  %s826_s7 = int_to_ptr.vmem [resolvable:$true] %s825_s7 }
  0x39   :  { %v1043_v3 = vld [vmem:[#allocation5 + $0x80] sm:$0xff]   ;;  %930 = vmatprep.subr.bf16.mxu1 %v1042_v2  ;;  %910 = vmatprep.subr.bf16.mxu0 %v1044_v4  ;;  %v1047_v7 = vld [vmem:[#allocation5 + $0x88] sm:$0xff]   ;;  %v1050_v10 = vld [vmem:[#allocation5 + $0xd0] sm:$0xff]   ;;  %s1177_s8 = scalar_lea.vmem %s826_s7, 128  ;;  %p1182_p11 = scmp.lt.s32.totalorder %s826_s7, %s826_s7 }
  0x3a   :  { %931 = vmatpush3.bf16.msra.mxu1 %v1043_v3  ;;  %v1051_v11 = vld [vmem:[#allocation5 + $0x90] sm:$0xff]   ;;  %v1052_v12 = vld [vmem:[#allocation5 + $0x58] sm:$0xff]   ;;  %v1056_v16 = vld [vmem:[#allocation5 + $0x60] sm:$0xff]   ;;  %p1178_p10 = scmp.ne.s32.totalorder %s826_s7, %s1177_s8  ;;  %p1183_p12 = scmp.lt.s32.totalorder %s1177_s8, %s1177_s8 }
  0x3b   :  { %932 = vmatprep.subr.bf16.mxu1 %v1046_v6  ;;  %v1053_v13 = vld [vmem:[#allocation5 + $0x18] sm:$0xff]   ;;  %v1057_v17 = vld [vmem:[#allocation5 + $0x20] sm:$0xff]   ;;  %v1060_v20 = vld [vmem:[#allocation5 + $0x68] sm:$0xff]  }
  0x3c   :  { %911 = vmatpush3.bf16.msra.mxu0 %v1045_v5  ;;  %v1054_v14 = vld [vmem:[#allocation5 + $0xd8] sm:$0xff]   ;;  %v1058_v18 = vld [vmem:[#allocation5 + $0xe0] sm:$0xff]   ;;  %v1061_v21 = vld [vmem:[#allocation5 + $0x28] sm:$0xff]   ;;  %p1184_p13 = por %p1183_p12, %p1182_p11 }
  0x3d   :  { %912 = vmatprep.subr.bf16.mxu0 %v1048_v8  ;;  %v1055_v15 = vld [vmem:[#allocation5 + $0x98] sm:$0xff]   ;;  %v1059_v19 = vld [vmem:[#allocation5 + $0xa0] sm:$0xff]   ;;  %v1062_v22 = vld [vmem:[#allocation5 + $0xe8] sm:$0xff]  }
  0x3e   :  { %933 = vmatpush3.bf16.msra.mxu1 %v1047_v7  ;;  %v1063_v23 = vld [vmem:[#allocation5 + $0xa8] sm:$0xff]   ;;  %v1064_v24 = vld [vmem:[#allocation5 + $0x70] sm:$0xff]   ;;  %v1068_v28 = vld [vmem:[#allocation5 + $0x78] sm:$0xff]   ;;  %p1185_p0 = pnand %p1184_p13, %p1178_p10 }
  0x3f   :  { %934 = vmatprep.subr.bf16.mxu1 %v1050_v10  ;;  %v1065_v25 = vld [vmem:[#allocation5 + $0x30] sm:$0xff]   ;;  %v1069_v29 = vld [vmem:[#allocation5 + $0x38] sm:$0xff]   ;;  %v61_v31 = vld [vmem:[#allocation2] sm:$0xff] }
  0x40   :  { %913 = vmatpush3.bf16.msra.mxu0 %v1049_v9  ;;  %v1066_v26 = vld [vmem:[#allocation5 + $0xf0] sm:$0xff]   ;;  %v1070_v30 = vld [vmem:[#allocation5 + $0xf8] sm:$0xff]   ;;  %v836_v32 = vcombine.low %v61_v31, %v61_v31  ;;  %v837_v33 = vcombine.high %v61_v31, %v61_v31  ;;  %v1074_v35 = vld [vmem:[#allocation5 + $0x140] sm:$0xff]  }
  0x41   :  { %914 = vmatprep.subr.bf16.mxu0 %v1052_v12  ;;  %v1067_v27 = vld [vmem:[#allocation5 + $0xb0] sm:$0xff]   ;;  %v1073_v34 = vld [vmem:[#allocation5 + $0xb8] sm:$0xff]   ;;  %v1077_v39 = vld [vmem:[#allocation5 + $0x100] sm:$0xff]  }
  0x42   :  { %935 = vmatpush3.bf16.msra.mxu1 %v1051_v11  ;;  %v62_v36 = vld [vmem:[#allocation2 + $0x8] sm:$0xff]  ;;  %577 = vmatprep.mubr.bf16.mxu0 %v837_v33  ;;  %v1078_v40 = vld [vmem:[#allocation5 + $0x180] sm:$0xff]   ;;  %v1085_v48 = vld [vmem:[#allocation5 + $0x158] sm:$0xff]  }
  0x43   :  { %936 = vmatprep.subr.bf16.mxu1 %v1054_v14  ;;  %v838_v37 = vcombine.low %v62_v36, %v62_v36  ;;  %v839_v38 = vcombine.high %v62_v36, %v62_v36  ;;  %v1079_v41 = vld [vmem:[#allocation5 + $0x148] sm:$0xff]   ;;  %v1082_v45 = vld [vmem:[#allocation5 + $0x150] sm:$0xff]   ;;  %v1086_v49 = vld [vmem:[#allocation5 + $0x118] sm:$0xff]  }
  0x44   :  { %915 = vmatpush3.bf16.msra.mxu0 %v1053_v13  ;;  %v1080_v43 = vld [vmem:[#allocation5 + $0x108] sm:$0xff]   ;;  %v1083_v46 = vld [vmem:[#allocation5 + $0x110] sm:$0xff]   ;;  %v1088_v50 = vld [vmem:[#allocation5 + $0x160] sm:$0xff]  }
  0x45   :  { %916 = vmatprep.subr.bf16.mxu0 %v1056_v16  ;;  %617 = vmatprep.mubr.bf16.mxu1 %v839_v38  ;;  %v1081_v44 = vld [vmem:[#allocation5 + $0x188] sm:$0xff]   ;;  %v1084_v47 = vld [vmem:[#allocation5 + $0x190] sm:$0xff]   ;;  %v1087_v51 = vld [vmem:[#allocation5 + $0x198] sm:$0xff]  }
  0x46   :  { %937 = vmatpush3.bf16.msra.mxu1 %v1055_v15  ;;  %v1089_v52 = vld [vmem:[#allocation5 + $0x120] sm:$0xff]   ;;  %v1091_v53 = vld [vmem:[#allocation5 + $0x168] sm:$0xff]   ;;  %v1094_v56 = vld [vmem:[#allocation5 + $0x170] sm:$0xff]  }
  0x47   :  { %938 = vmatprep.subr.bf16.mxu1 %v1058_v18  ;;  %v1090_v54 = vld [vmem:[#allocation5 + $0x1a0] sm:$0xff]   ;;  %v1092_v55 = vld [vmem:[#allocation5 + $0x128] sm:$0xff]   ;;  %v1095_v58 = vld [vmem:[#allocation5 + $0x130] sm:$0xff]  }
  0x48   :  { %917 = vmatpush3.bf16.msra.mxu0 %v1057_v17  ;;  %v1093_v57 = vld [vmem:[#allocation5 + $0x1a8] sm:$0xff]   ;;  %v63_v59 = vld [vmem:[#allocation2 + $0x10] sm:$0xff]  ;;  %v1102_v2 = vld [vmem:[#allocation2 + $0x18] ss:$0 sps:$4 sm:$0xff]  }
  0x49   :  { %918 = vmatprep.subr.bf16.mxu0 %v1060_v20  ;;  %v1096_v60 = vld [vmem:[#allocation5 + $0x1b0] sm:$0xff]   ;;  %v841_v61 = vcombine.high %v63_v59, %v63_v59  ;;  %v1097_v62 = vld [vmem:[#allocation5 + $0x178] sm:$0xff]   ;;  %v840_v1 = vcombine.low %v63_v59, %v63_v59  ;;  %v1103_v3 = vld [vmem:[#allocation7] sm:$0xff]  }
  0x4a   :  { %939 = vmatpush3.bf16.msra.mxu1 %v1059_v19  ;;  %v1098_v63 = vld [vmem:[#allocation5 + $0x138] sm:$0xff]   ;;  %v1104_v4 = vld [vmem:[#allocation7 + $0x8] sm:$0xff]   ;;  %v1105_v5 = vld [vmem:[#allocation7 + $0x10] sm:$0xff]  }
  0x4b   :  { %940 = vmatprep.subr.bf16.mxu1 %v1062_v22  ;;  %v1101_v0 = vld [vmem:[#allocation5 + $0x1b8] sm:$0xff]   ;;  %v1107_v7 = vld [vmem:[#allocation7 + $0x20] sm:$0xff]   ;;  %v1108_v8 = vld [vmem:[#allocation7 + $0x28] sm:$0xff]  }
  0x4c   :  { %919 = vmatpush3.bf16.msra.mxu0 %v1061_v21  ;;  %v1106_v6 = vld [vmem:[#allocation7 + $0x18] sm:$0xff]   ;;  %v1109_v9 = vld [vmem:[#allocation7 + $0x30] sm:$0xff]   ;;  %v835_v12 = vld [vmem:[%s1325_s2] ss:$0 sm:$0xff] }
  0x4d   :  { %920 = vmatprep.subr.bf16.mxu0 %v1064_v24  ;;  %v1110_v10 = vld [vmem:[#allocation7 + $0x38] sm:$0xff]  }
  0x4e   :  { %941 = vmatpush3.bf16.msra.mxu1 %v1063_v23 }
  0x4f   :  { %942 = vmatprep.subr.bf16.mxu1 %v1066_v26 }
  0x50   :  { %921 = vmatpush3.bf16.msra.mxu0 %v1065_v25 }
  0x51   :  { %922 = vmatprep.subr.bf16.mxu0 %v1068_v28 }
  0x52   :  { %943 = vmatpush3.bf16.msra.mxu1 %v1067_v27 }
  0x53   :  { %944 = vmatprep.subr.bf16.mxu1 %v1070_v30 }
  0x54   :  { %923 = vmatpush3.bf16.msra.mxu0 %v1069_v29 }
  0x55   :  { %952 = vmatprep.subr.bf16.mxu0 %v1074_v35 }
  0x56   :  { %945 = vmatpush3.bf16.msra.mxu1 %v1073_v34 }
  0x57   :  { %578 = vmatmul.mubr.bf16.vlgmr.msra.gmra.mrb[0].mxu0 %v836_v32  ;;  %992 = vmatprep.subr.bf16.mxu1 %v1210_v42 }
  0x58   :  { %953 = vmatpush3.bf16.msra.mxu0 %v1077_v39  ;;  %657 = vmatprep.mubr.bf16.mxu0 %v841_v61 }
  0x59   :  { %618 = vmatmul.mubr.bf16.vlgmr.msra.gmra.mrb[0].mxu1 %v838_v37  ;;  %954 = vmatprep.subr.bf16.mxu0 %v1079_v41  ;;  %v899_v37 = vld [vmem:[%s1327_s4] ss:$0 sm:$0xff] }
  0x5a   :  { %993 = vmatpush3.bf16.msra.mxu1 %v1078_v40  ;;  %1008 = vmatprep.mubr.msk.bf16.mxu1 %vm1211_vm0, %v1210_v42 }
  0x5b   :  { %994 = vmatprep.subr.bf16.mxu1 %v1210_v42 }
  0x5c   :  { %955 = vmatpush3.bf16.msra.mxu0 %v1080_v43 }
  0x5d   :  { %956 = vmatprep.subr.bf16.mxu0 %v1082_v45 }
  0x5e   :  { %995 = vmatpush3.bf16.msra.mxu1 %v1081_v44 }
  0x5f   :  { %996 = vmatprep.subr.bf16.mxu1 %v1210_v42 }
  0x60   :  { %957 = vmatpush3.bf16.msra.mxu0 %v1083_v46 }
  0x61   :  { %958 = vmatprep.subr.bf16.mxu0 %v1085_v48 }
  0x62   :  { %997 = vmatpush3.bf16.msra.mxu1 %v1084_v47 }
  0x63   :  { %998 = vmatprep.subr.bf16.mxu1 %v1210_v42 }
  0x64   :  { %959 = vmatpush3.bf16.msra.mxu0 %v1086_v49 }
  0x65   :  { %960 = vmatprep.subr.bf16.mxu0 %v1088_v50 }
  0x66   :  { %999 = vmatpush3.bf16.msra.mxu1 %v1087_v51 }
  0x67   :  { %1000 = vmatprep.subr.bf16.mxu1 %v1210_v42 }
  0x68   :  { %961 = vmatpush3.bf16.msra.mxu0 %v1089_v52 }
  0x69   :  { %962 = vmatprep.subr.bf16.mxu0 %v1091_v53 }
  0x6a   :  { %1001 = vmatpush3.bf16.msra.mxu1 %v1090_v54 }
  0x6b   :  { %1002 = vmatprep.subr.bf16.mxu1 %v1210_v42 }
  0x6c   :  { %963 = vmatpush3.bf16.msra.mxu0 %v1092_v55 }
  0x6d   :  { %964 = vmatprep.subr.bf16.mxu0 %v1094_v56 }
  0x6e   :  { %1003 = vmatpush3.bf16.msra.mxu1 %v1093_v57 }
  0x6f   :  { %1004 = vmatprep.subr.bf16.mxu1 %v1210_v42 }
  0x70   :  { %965 = vmatpush3.bf16.msra.mxu0 %v1095_v58 }
  0x71   :  { %966 = vmatprep.subr.bf16.mxu0 %v1097_v62 }
  0x72   :  { %1005 = vmatpush3.bf16.msra.mxu1 %v1096_v60 }
  0x73   :  { %1006 = vmatprep.subr.bf16.mxu1 %v1210_v42 }
  0x74   :  { %967 = vmatpush3.bf16.msra.mxu0 %v1098_v63 }
  0x75   :  { %1012 = vmatprep.subr.bf16.mxu0 %v1210_v42 }
  0x76   :  { %1007 = vmatpush3.bf16.msra.mxu1 %v1101_v0 }
  0x77   :  { %658 = vmatmul.mubr.bf16.vlgmr.msra.gmra.mrb[4].mxu0 %v840_v1 }
  0x78   :  { %1028 = vmatprep.mubr.msk.bf16.mxu0 %vm1211_vm0, %v1210_v42  ;;  %1013 = vmatpush3.bf16.msra.mxu0 %v1103_v3 }
  0x79   :  { %1009 = vmatmul.mubr.bf16.vlgmr.msra.gmra.mrb[4].mxu1 %v1102_v2  ;;  %1014 = vmatprep.subr.bf16.mxu0 %v1210_v42 }
  0x7c   :  { %1015 = vmatpush3.bf16.msra.mxu0 %v1104_v4 }
  0x7d   :  { %1016 = vmatprep.subr.bf16.mxu0 %v1210_v42 }
  0x80   :  { %1017 = vmatpush3.bf16.msra.mxu0 %v1105_v5 }
  0x81   :  { %1018 = vmatprep.subr.bf16.mxu0 %v1210_v42 }
  0x84   :  { %1019 = vmatpush3.bf16.msra.mxu0 %v1106_v6 }
  0x85   :  { %1020 = vmatprep.subr.bf16.mxu0 %v1210_v42 }
  0x88   :  { %1021 = vmatpush3.bf16.msra.mxu0 %v1107_v7 }
  0x89   :  { %1022 = vmatprep.subr.bf16.mxu0 %v1210_v42 }
  0x8c   :  { %1023 = vmatpush3.bf16.msra.mxu0 %v1108_v8 }
  0x8d   :  { %1024 = vmatprep.subr.bf16.mxu0 %v1210_v42 }
  0x90   :  { %1025 = vmatpush3.bf16.msra.mxu0 %v1109_v9 }
  0x91   :  { %1026 = vmatprep.subr.bf16.mxu0 %v1210_v42 }
  0x94   :  { %1027 = vmatpush3.bf16.msra.mxu0 %v1110_v10 }
 0x12a   :  { %v924_v11 = vpop.f32.mrb[0].mxu0 }
 0x12b   :  { %v925_v13 = vpop.f32.mrb[1].mxu0 }
 0x12c   :  { %v926_v14 = vadd.f32 %v925_v13, %v924_v11  ;;  %v927_v15 = vpop.f32.mrb[2].mxu0  ;;  %v946_v16 = vpop.f32.mrb[0].mxu1 }
 0x12d   :  { %v928_v17 = vpop.f32.mrb[3].mxu0  ;;  %v947_v18 = vpop.f32.mrb[1].mxu1 }
 0x12e   :  { %v580_v19 = vadd.f32 %v926_v14, %v835_v12  ;;  %v948_v20 = vadd.f32 %v947_v18, %v946_v16  ;;  %v949_v21 = vpop.f32.mrb[2].mxu1 }
 0x12f   :  { %v950_v22 = vpop.f32.mrb[3].mxu1 }
 0x130   :  { %v620_v23 = vadd.f32 %v948_v20, %v580_v19 }
 0x14a   :  { %v968_v24 = vpop.f32.mrb[4].mxu0 }
 0x14b   :  { %v969_v25 = vpop.f32.mrb[5].mxu0 }
 0x14c   :  { %v970_v26 = vadd.f32 %v969_v25, %v968_v24  ;;  %v971_v27 = vpop.f32.mrb[6].mxu0  ;;  %v699_v28 = vpop.f32.mrb[4].mxu1 }
 0x14d   :  { %v972_v29 = vpop.f32.mrb[7].mxu0  ;;  %v1010_v30 = vpop.f32.mrb[5].mxu1 }
 0x14e   :  { %v660_v31 = vadd.f32 %v970_v26, %v620_v23  ;;  %v702_v32 = vpop.f32.mrb[6].mxu1 }
 0x14f   :  { %v1011_v33 = vpop.f32.mrb[7].mxu1 }
 0x150   :  { %v700_v34 = vadd.f32 %v699_v28, %v660_v31 }
 0x152   :  { %v705_v35 = vmax.f32 %v700_v34, 0.0 }
 0x154   :  { %v706_v36 = vpack.c.bf16 %v705_v35, %v705_v35 }
 0x156   :  { %1029 = vmatmul.mubr.bf16.vlgmr.msra.gmra.mrb[8].mxu0 %v706_v36 }
 0x229   :  { %v812_v38 = vpop.f32.mrb[8].mxu0 }
 0x22a   :  { %v813_v39 = vadd.f32 %v899_v37, %v812_v38  ;;  %v1030_v40 = vpop.f32.mrb[9].mxu0 }
 0x22b   :  { %v815_v41 = vpop.f32.mrb[10].mxu0 }
 0x22c   :  { %818 = vst [vmem:[#allocation8] sm:$0xff] %v813_v39  ;;  %v1031_v42 = vpop.f32.mrb[11].mxu0 }
 0x22d   :  { %1188 = shalt.err (!%p1185_p0)
}
 0x22e   :  { %s1189_s4 = scalar_lea.hbm %s1328_s5, 128 }
 0x22f   :  { %p1190_p1 = scmp.ne.s32.totalorder %s1328_s5, %s1189_s4  ;;  %p1193_p2 = scmp.lt.u32.totalorder %s1189_s4, %s1328_s5 }
 0x231   :  { %p1195_p3 = pnand %p1193_p2, %p1190_p1 }
 0x233   :  { %1198 = shalt.err (!%p1195_p3)
}
 0x234   :  { %828 = dma.vmem_to_hbm [thread:$0]  %s826_s7, 128, %s1328_s5, [#allocation4]  }
 0x235   :  { %1203 = dma.done.wait [#allocation4], 128  }
 0x236   :  { %1204 = vsyncadd [#allocation4], 4294967168 }
 0x237   :  { %832 = vsyncpa [#allocation3], 1 }
 0x238   :  { %833 = vsyncpa [#allocation6], 1 }
 0x239   :  { %834 = vsyncpa [#allocation4], 1 }

</bundles_post_ra>
